<compile_context>
chip_gen: v5e
topology: v5e:2x2
jax: 0.10.0
libtpu: 0.0.40
codegen_flags: <defaults>
</compile_context>

<pallas_src>
import functools
import math

import jax
import jax.numpy as jnp
from jax.experimental import pallas as pl
from jax.experimental.pallas import tpu as pltpu


def _round_up(x: int, m: int) -> int:
    return ((x + m - 1) // m) * m


def _size_embedder_kernel(s_ref, freqs_ref, w1_ref, b1_ref, w2_ref, b2_ref,
                          o_ref, *, tile_b, h_pad, d_block):
    """One grid step: embed `d_block` size columns for `tile_b` batch rows.

    s_ref    : (d_block, tile_b, 1)   f32   raw scalar sizes
    freqs_ref: (1, half)              f32   precomputed exp() frequency table
    w1_ref   : (2*half, h_pad)        bf16  layer-1 weight (rows = [cos | sin])
    b1_ref   : (1, h_pad)             f32
    w2_ref   : (h_pad, h_pad)         bf16
    b2_ref   : (1, h_pad)             f32
    o_ref    : (tile_b, d_block*h_pad)      final (b, d*H) layout, lane-aligned
    """
    freqs = freqs_ref[...]                                    # (1, half)
    s = s_ref[...].astype(jnp.float32)                        # (d_block, tile_b, 1)

    # Stack the size columns along the sublane (M) axis: (d_block*tile_b, 1).
    if d_block > 1:
        t = jnp.concatenate([s[d] for d in range(d_block)], axis=0)
    else:
        t = s[0]

    # Sinusoidal embedding; [cos | sin] concat at a 128-aligned lane boundary
    # -> a single K = 2*half layer-1 matmul.
    args = t * freqs                                          # (d_block*tile_b, half)
    emb = jnp.concatenate([jnp.cos(args), jnp.sin(args)], axis=-1)
    emb = emb.astype(jnp.bfloat16)                            # (d_block*tile_b, 2*half)

    # Layer 1 + SiLU (f32 accumulate / activation).
    h = jnp.dot(emb, w1_ref[...], preferred_element_type=jnp.float32) + b1_ref[...]
    h = h * jax.nn.sigmoid(h)

    # Layer 2: ONE (d_block*tile_b, h_pad) @ (h_pad, h_pad) pass.
    out = jnp.dot(h.astype(jnp.bfloat16), w2_ref[...],
                  preferred_element_type=jnp.float32) + b2_ref[...]

    # Write each row group d into its 128-aligned column slab (static slices).
    for d in range(d_block):
        o_ref[:, d * h_pad:(d + 1) * h_pad] = (
            out[d * tile_b:(d + 1) * tile_b, :].astype(o_ref.dtype))


def prepare_size_embedder_params(params, *, hidden_size, freq_size,
                                 max_period=10000.0,
                                 weight_dtype=jnp.bfloat16):
    """One-time parameter prep (hoisted out of the per-call forward).

    - builds the exp() frequency table,
    - trims w1 to its first 2*half rows (the torch zero-pad column for odd
      freq_size multiplies a w1 row that contributes nothing -> exact),
    - zero-pads hidden_size up to a multiple of 128 (lane-aligned stores),
    - casts matmul weights to `weight_dtype` (bf16 by default).
    """
    w1, b1, w2, b2 = params
    half = freq_size // 2
    h_pad = _round_up(hidden_size, 128)
    pad_h = h_pad - hidden_size

    freqs = jnp.exp(
        -math.log(max_period) * jnp.arange(half, dtype=jnp.float32) / half
    ).reshape(1, half)

    w1p = jnp.pad(w1[:2 * half].astype(jnp.float32),
                  ((0, 0), (0, pad_h))).astype(weight_dtype)
    b1p = jnp.pad(b1.astype(jnp.float32), (0, pad_h)).reshape(1, h_pad)
    w2p = jnp.pad(w2.astype(jnp.float32),
                  ((0, pad_h), (0, pad_h))).astype(weight_dtype)
    b2p = jnp.pad(b2.astype(jnp.float32), (0, pad_h)).reshape(1, h_pad)
    return freqs, w1p, b1p, w2p, b2p


def size_embedder_forward(s, bs, prepared_params, *, hidden_size, tile_b=256,
                          out_dtype=jnp.bfloat16):
    """JAX/Pallas equivalent of SizeEmbedder.forward(s, bs)."""
    freqs, w1p, b1p, w2p, b2p = prepared_params
    half = freqs.shape[1]
    h_pad = w2p.shape[0]

    if s.ndim == 1:
        s = s[:, None]
    assert s.ndim == 2
    if s.shape[0] != bs:
        if bs % s.shape[0] != 0:
            raise ValueError(f"bs={bs} must be a multiple of s.shape[0]={s.shape[0]}")
        s = jnp.tile(s, (bs // s.shape[0], 1))
    b, dims = s.shape
    assert b == bs

    # Batch-row tiling (sublane-aligned).
    tile_b = _round_up(min(tile_b, _round_up(b, 8)), 8)
    b_pad = _round_up(b, tile_b)
    num_b_tiles = b_pad // tile_b

    # Lay sizes out as (dims, b_pad, 1) so every (dims group, batch tile) is a
    # contiguous rectangular block for BlockSpec.
    s_f = s.astype(jnp.float32)
    if b_pad != b:
        s_f = jnp.pad(s_f, ((0, b_pad - b), (0, 0)))
    s_t = s_f.T[:, :, None]                                   # (dims, b_pad, 1)

    # dims handling:
    #  * multi-tile batch: stack all dims into the M axis (one w1/w2 pass/step)
    #  * single-tile batch: split dims across a second parallel grid axis so
    #    both TensorCores get work on v7x megacore.
    if num_b_tiles >= 2 or dims == 1:
        d_block = dims
    else:
        d_block = 1
    num_d_blocks = dims // d_block
    grid = (num_b_tiles, num_d_blocks)

    kernel = functools.partial(_size_embedder_kernel,
                               tile_b=tile_b, h_pad=h_pad, d_block=d_block)

    n_rows = b_pad * dims
    flops = int(2 * n_rows * (2 * half * h_pad + h_pad * h_pad))
    transcendentals = int(n_rows * (2 * half + h_pad))        # cos, sin, sigmoid
    bytes_accessed = int(
        s_t.size * 4
        + b_pad * dims * h_pad * jnp.dtype(out_dtype).itemsize
        + (w1p.size + w2p.size) * w1p.dtype.itemsize
        + (b1p.size + b2p.size + freqs.size) * 4)

    out = pl.pallas_call(
        kernel,
        out_shape=jax.ShapeDtypeStruct((b_pad, dims * h_pad), out_dtype),
        grid_spec=pltpu.PrefetchScalarGridSpec(
            num_scalar_prefetch=0,
            grid=grid,
            in_specs=[
                pl.BlockSpec((d_block, tile_b, 1), lambda i, j: (j, i, 0)),  # sizes
                pl.BlockSpec((1, half), lambda i, j: (0, 0)),                # freqs
                pl.BlockSpec((2 * half, h_pad), lambda i, j: (0, 0)),        # w1
                pl.BlockSpec((1, h_pad), lambda i, j: (0, 0)),               # b1
                pl.BlockSpec((h_pad, h_pad), lambda i, j: (0, 0)),           # w2
                pl.BlockSpec((1, h_pad), lambda i, j: (0, 0)),               # b2
            ],
            out_specs=pl.BlockSpec((tile_b, d_block * h_pad),
                                   lambda i, j: (i, j)),
        ),
        compiler_params=pltpu.CompilerParams(
            dimension_semantics=("parallel", "parallel"),
            vmem_limit_bytes=32 * 1024 * 1024),
        cost_estimate=pl.CostEstimate(flops=flops,
                                      transcendentals=transcendentals,
                                      bytes_accessed=bytes_accessed),
    )(s_t, freqs, w1p, b1p, w2p, b2p)

    out = out[:b]
    if h_pad != hidden_size:
        # Strip the 128-alignment padding (only hit when H % 128 != 0, e.g.
        # the small test config; real DiT H=1152 takes the no-copy path).
        out = out.reshape(b, dims, h_pad)[:, :, :hidden_size].reshape(
            b, dims * hidden_size)
    return out


def init_params(key, hidden_size, freq_size):
    k1, k2, k3, k4 = jax.random.split(key, 4)
    # nn.Linear weights, stored transposed so the kernel computes x @ W.
    w1 = jax.random.normal(k1, (freq_size, hidden_size), jnp.float32) * 0.02
    b1 = jax.random.normal(k2, (hidden_size,), jnp.float32) * 0.02
    w2 = jax.random.normal(k3, (hidden_size, hidden_size), jnp.float32) * 0.02
    b2 = jax.random.normal(k4, (hidden_size,), jnp.float32) * 0.02
    return w1, b1, w2, b2


def _reference(s, bs, params, hidden_size, freq_size, max_period=10000.0):
    # Pure-JAX f32 reference mirroring the PyTorch module.
    w1, b1, w2, b2 = params
    if s.ndim == 1:
        s = s[:, None]
    if s.shape[0] != bs:
        s = jnp.tile(s, (bs // s.shape[0], 1))
    b, dims = s.shape
    t = s.reshape(-1).astype(jnp.float32)
    half = freq_size // 2
    freqs = jnp.exp(-math.log(max_period)
                    * jnp.arange(half, dtype=jnp.float32) / half)
    args = t[:, None] * freqs[None]
    emb = jnp.concatenate([jnp.cos(args), jnp.sin(args)], axis=-1)
    h = emb @ w1 + b1
    h = h * jax.nn.sigmoid(h)
    out = h @ w2 + b2
    return out.reshape(b, dims * hidden_size)


if __name__ == "__main__":
    hidden_size = 32
    freq_size = 256

    key = jax.random.PRNGKey(0)
    kp, ks1, ks2 = jax.random.split(key, 3)
    raw_params = init_params(kp, hidden_size, freq_size)
    prepared = prepare_size_embedder_params(
        raw_params, hidden_size=hidden_size, freq_size=freq_size)

    # Case 1: tiny batch -> single batch tile, dims split across the second
    # parallel grid axis; also exercises the H-padding (32 -> 128) path.
    bs1 = 2
    s1 = jax.random.uniform(ks1, (bs1, 2), jnp.float32, minval=0.0, maxval=512.0)
    out1 = jax.block_until_ready(
        size_embedder_forward(s1, bs1, prepared, hidden_size=hidden_size))
    ref1 = _reference(s1, bs1, raw_params, hidden_size, freq_size)
    assert out1.shape == (bs1, 2 * hidden_size), out1.shape
    err1 = float(jnp.max(jnp.abs(out1.astype(jnp.float32) - ref1)))
    assert err1 < 5e-3, err1    # bf16 MXU operands + bf16 output, f32 accumulate

    # Case 2: multi-tile batch -> dims stacked into the M axis; also exercises
    # the `s.shape[0] != bs` repeat path.
    bs2 = 24
    s2 = jax.random.uniform(ks2, (1, 2), jnp.float32, minval=0.0, maxval=512.0)
    out2 = jax.block_until_ready(
        size_embedder_forward(s2, bs2, prepared, hidden_size=hidden_size, tile_b=8))
    ref2 = _reference(s2, bs2, raw_params, hidden_size, freq_size)
    assert out2.shape == (bs2, 2 * hidden_size), out2.shape
    err2 = float(jnp.max(jnp.abs(out2.astype(jnp.float32) - ref2)))
    assert err2 < 5e-3, err2

    print("KERNEL_OK")
</pallas_src>

<mosaic_0001>
module attributes {stable_mosaic.version = 11 : i64} {
  func.func @_size_embedder_kernel(%arg0: i32, %arg1: i32, %arg2: memref<1x8x1xf32, #tpu.memory_space<vmem>>, %arg3: memref<1x128xf32, #tpu.memory_space<vmem>>, %arg4: memref<256x128xbf16, #tpu.memory_space<vmem>>, %arg5: memref<1x128xf32, #tpu.memory_space<vmem>>, %arg6: memref<128x128xbf16, #tpu.memory_space<vmem>>, %arg7: memref<1x128xf32, #tpu.memory_space<vmem>>, %arg8: memref<8x128xbf16, #tpu.memory_space<vmem>>) attributes {dimension_semantics = [#tpu.dimension_semantics<parallel>, #tpu.dimension_semantics<parallel>], iteration_bounds = array<i64: 1, 2>, scalar_prefetch = 0 : i64, scratch_operands = 0 : i64, tpu.core_type = #tpu.core_type<tc>, window_params = [{transform_indices = @transform_0, window_bounds = array<i64: 1, 8, 1>}, {pipeline_mode = #tpu.pipeline_mode<synchronous>, transform_indices = @transform_1, window_bounds = array<i64: 1, 128>}, {pipeline_mode = #tpu.pipeline_mode<synchronous>, transform_indices = @transform_2, window_bounds = array<i64: 256, 128>}, {pipeline_mode = #tpu.pipeline_mode<synchronous>, transform_indices = @transform_3, window_bounds = array<i64: 1, 128>}, {pipeline_mode = #tpu.pipeline_mode<synchronous>, transform_indices = @transform_4, window_bounds = array<i64: 128, 128>}, {pipeline_mode = #tpu.pipeline_mode<synchronous>, transform_indices = @transform_5, window_bounds = array<i64: 1, 128>}, {transform_indices = @transform_6, window_bounds = array<i64: 8, 128>}]} {
    %c0 = arith.constant 0 : index
    %c0_0 = arith.constant 0 : index
    %0 = vector.load %arg3[%c0, %c0_0] : memref<1x128xf32, #tpu.memory_space<vmem>>, vector<1x128xf32>
    %c0_1 = arith.constant 0 : index
    %c0_2 = arith.constant 0 : index
    %c0_3 = arith.constant 0 : index
    %1 = vector.load %arg2[%c0_1, %c0_2, %c0_3] : memref<1x8x1xf32, #tpu.memory_space<vmem>>, vector<1x8x1xf32>
    %2 = vector.shape_cast %1 : vector<1x8x1xf32> to vector<8x1xf32>
    %3 = vector.broadcast %2 : vector<8x1xf32> to vector<8x128xf32>
    %4 = vector.broadcast %0 : vector<1x128xf32> to vector<8x128xf32>
    %5 = arith.mulf %3, %4 : vector<8x128xf32>
    %6 = math.cos %5 : vector<8x128xf32>
    %7 = math.sin %5 : vector<8x128xf32>
    %8 = tpu.concatenate %6, %7 in 1 : vector<8x128xf32>, vector<8x128xf32> -> vector<8x256xf32>
    %9 = arith.truncf %8 : vector<8x256xf32> to vector<8x256xbf16>
    %c0_4 = arith.constant 0 : index
    %c0_5 = arith.constant 0 : index
    %10 = vector.load %arg4[%c0_4, %c0_5] : memref<256x128xbf16, #tpu.memory_space<vmem>>, vector<256x128xbf16>
    %cst = arith.constant dense<0.000000e+00> : vector<8x128xf32>
    %11 = tpu.matmul %9, %10, %cst {dimension_numbers = #tpu.dot_dimension_numbers<[1], [0], [0], [1], [0, 0, 1, 1], [], []>} : vector<8x256xbf16>, vector<256x128xbf16>, vector<8x128xf32> -> vector<8x128xf32>
    %c0_6 = arith.constant 0 : index
    %c0_7 = arith.constant 0 : index
    %12 = vector.load %arg5[%c0_6, %c0_7] : memref<1x128xf32, #tpu.memory_space<vmem>>, vector<1x128xf32>
    %13 = vector.broadcast %12 : vector<1x128xf32> to vector<8x128xf32>
    %14 = arith.addf %11, %13 : vector<8x128xf32>
    %15 = arith.negf %14 : vector<8x128xf32>
    %16 = math.exp %15 : vector<8x128xf32>
    %cst_8 = arith.constant 1.000000e+00 : f32
    %17 = vector.broadcast %cst_8 : f32 to vector<8x128xf32>
    %18 = arith.addf %17, %16 : vector<8x128xf32>
    %19 = arith.divf %17, %18 : vector<8x128xf32>
    %20 = arith.mulf %14, %19 : vector<8x128xf32>
    %21 = arith.truncf %20 : vector<8x128xf32> to vector<8x128xbf16>
    %c0_9 = arith.constant 0 : index
    %c0_10 = arith.constant 0 : index
    %22 = vector.load %arg6[%c0_9, %c0_10] : memref<128x128xbf16, #tpu.memory_space<vmem>>, vector<128x128xbf16>
    %cst_11 = arith.constant dense<0.000000e+00> : vector<8x128xf32>
    %23 = tpu.matmul %21, %22, %cst_11 {dimension_numbers = #tpu.dot_dimension_numbers<[1], [0], [0], [1], [0, 0, 1, 1], [], []>} : vector<8x128xbf16>, vector<128x128xbf16>, vector<8x128xf32> -> vector<8x128xf32>
    %c0_12 = arith.constant 0 : index
    %c0_13 = arith.constant 0 : index
    %24 = vector.load %arg7[%c0_12, %c0_13] : memref<1x128xf32, #tpu.memory_space<vmem>>, vector<1x128xf32>
    %25 = vector.broadcast %24 : vector<1x128xf32> to vector<8x128xf32>
    %26 = arith.addf %23, %25 : vector<8x128xf32>
    %27 = arith.truncf %26 : vector<8x128xf32> to vector<8x128xbf16>
    %c0_14 = arith.constant 0 : index
    %c0_15 = arith.constant 0 : index
    %28 = vector.load %arg8[%c0_14, %c0_15] : memref<8x128xbf16, #tpu.memory_space<vmem>>, vector<8x128xbf16>
    tpu.vector_store %arg8[%c0_14, %c0_15], %27 {strides = array<i32>} : memref<8x128xbf16, #tpu.memory_space<vmem>>, vector<8x128xbf16>,
    return
  }
  func.func @transform_0(%arg0: i32, %arg1: i32) -> (i32, i32, i32) {
    %c0_i32 = arith.constant 0 : i32
    %c0_i32_0 = arith.constant 0 : i32
    return %arg1, %arg0, %c0_i32 : i32, i32, i32
  }
  func.func @transform_1(%arg0: i32, %arg1: i32) -> (i32, i32) {
    %c0_i32 = arith.constant 0 : i32
    %c0_i32_0 = arith.constant 0 : i32
    %c0_i32_1 = arith.constant 0 : i32
    return %c0_i32, %c0_i32_0 : i32, i32
  }
  func.func @transform_2(%arg0: i32, %arg1: i32) -> (i32, i32) {
    %c0_i32 = arith.constant 0 : i32
    %c0_i32_0 = arith.constant 0 : i32
    %c0_i32_1 = arith.constant 0 : i32
    return %c0_i32, %c0_i32_0 : i32, i32
  }
  func.func @transform_3(%arg0: i32, %arg1: i32) -> (i32, i32) {
    %c0_i32 = arith.constant 0 : i32
    %c0_i32_0 = arith.constant 0 : i32
    %c0_i32_1 = arith.constant 0 : i32
    return %c0_i32, %c0_i32_0 : i32, i32
  }
  func.func @transform_4(%arg0: i32, %arg1: i32) -> (i32, i32) {
    %c0_i32 = arith.constant 0 : i32
    %c0_i32_0 = arith.constant 0 : i32
    %c0_i32_1 = arith.constant 0 : i32
    return %c0_i32, %c0_i32_0 : i32, i32
  }
  func.func @transform_5(%arg0: i32, %arg1: i32) -> (i32, i32) {
    %c0_i32 = arith.constant 0 : i32
    %c0_i32_0 = arith.constant 0 : i32
    %c0_i32_1 = arith.constant 0 : i32
    return %c0_i32, %c0_i32_0 : i32, i32
  }
  func.func @transform_6(%arg0: i32, %arg1: i32) -> (i32, i32) {
    %c0_i32 = arith.constant 0 : i32
    return %arg0, %arg1 : i32, i32
  }
}

</mosaic_0001>

<bundles_post_ra>
// kernel: tpu_custom_call.1
= control target key start
LH: loop header
LB: loop body
LE: loop exit
PB: predicated region body
PF: predicated region fallthrough
CT: control target
= control target key end

     0   :  { %11 = vsyncpa [#allocation3], 0  ;;  %s1626_s0 = inlined_call_operand.vmem [shape: f32[2,8,1], index: 0, kind: input, shape index: {}]   ;;  %s1627_s1 = inlined_call_operand.vmem [shape: f32[1,128], index: 1, kind: input, shape index: {}]   ;;  %s1628_s2 = inlined_call_operand.hbm [shape: bf16[256,128], index: 2, kind: input, shape index: {}]   ;;  %s1629_s3 = inlined_call_operand.vmem [shape: f32[1,128], index: 3, kind: input, shape index: {}]   ;;  %s1630_s4 = inlined_call_operand.hbm [shape: bf16[128,128], index: 4, kind: input, shape index: {}]   ;;  %s1631_s5 = inlined_call_operand.vmem [shape: f32[1,128], index: 5, kind: input, shape index: {}]   ;;  %s1632_s6 = inlined_call_operand.hbm [shape: bf16[8,256], index: 6, kind: output, shape index: {}]  }
   0x1   :  { %12 = vsyncpa [#allocation6], 0 }
   0x2   :  { %13 = vsyncpa [#allocation4], 0 }
   0x3   :  { %15 = vsyncpa [#allocation4 + $0x1], 0  ;;  %s1431_s21 = smov 0   ;;  %s1433_s22 = smov 0  }
   0x4   :  { %s1435_s23 = smov 0   ;;  %s1437_s24 = smov 0  }
   0x5   :  { %s1439_s25 = smov 0   ;;  %s1441_s26 = smov 0  }
   0x6 LB: > { %s1002_s27 = sadd.s32 4294967295, %s1383_s26   ;;  %s1003_s28 = sadd.s32 4294967294, %s1383_s26   ;;  %s1383_s26 = sphi %s1441_s26, %s21_s26   ;;  %s1379_s25 = sphi %s1439_s25, %s1641_s25   ;;  %s1375_s24 = sphi %s1437_s24, %s1640_s24   ;;  %s1371_s23 = sphi %s1435_s23, %s1639_s23   ;;  %s1367_s22 = sphi %s1433_s22, %s1638_s22   ;;  %s1363_s21 = sphi %s1431_s21, %s1637_s21  }
   0x7   : > { %s30_s29 = sadd.s32 1, %s1379_s25  ;;  %s175_s30 = sadd.s32 1, %s1371_s23 }
   0x8   : > { %p31_p0 = scmp.ge.s32.totalorder %s30_s29, 2  ;;  %p185_p1 = scmp.ne.s32.totalorder %s1371_s23, %s1367_s22 }
   0x9   : > { %p186_p2 = scmp.eq.s32.totalorder %s1002_s27, 1  ;;  %p191_p3 = scmp.ne.s32.totalorder %s1367_s22, %s1363_s21 }
   0xa   : > { %s1643_s29 = smov (%p31_p0, %s30_s29), 0  ;;  %p192_p5 = scmp.eq.s32.totalorder %s1003_s28, 1 }
   0xb   : > { %p1471_p4 = por %p186_p2, %p185_p1  ;;  %s171_s8 = ssub.s32 %s1379_s25, %s1643_s29 }
   0xc   : > { %p1004_p6 = scmp.ge.s32.totalorder %s1383_s26, 1  ;;  %p173_p7 = scmp.eq.s32.totalorder %s171_s8, 0 }
   0xd   : > { %p1478_p8 = por %p192_p5, %p191_p3  ;;  %p199_p9 = scmp.lt.s32.totalorder %s1383_s26, 3 }
   0xe   : > { %s1484_s10 = scalar_select %p173_p7, %s1371_s23, %s175_s30  }
   0xf   : > { %p1486_p10 = pnand %p1004_p6, %p199_p9  ;;  %p1490_p11 = scmp.eq.s32.totalorder %s1002_s27, 0 }
  0x10   : > { %s213_s15 = sshll.u32 %s1628_s2, 4  ;;  %s1385_s16 = smov [#allocation2]   ;;  %s214_s15 = int_to_ptr.hbm [resolvable:$true] %s213_s15 }
  0x11   : > { %p1154_p12 = pneg %p1486_p10  ;;  %s215_s17 = sshll.u32 %s1385_s16, 4  ;;  %s216_s17 = int_to_ptr.vmem [resolvable:$true] %s215_s17 }
  0x12   : > { %s230_s20 = sshll.u32 %s1630_s4, 4  ;;  %s1386_s27 = smov 64   ;;  %s231_s20 = int_to_ptr.hbm [resolvable:$true] %s230_s20 }
  0x13   : > { %p1155_p13 = pnand %p1490_p11, %p1154_p12  ;;  %s1387_s28 = smov 4  }
  0x14   : > { %s1388_s30 = smov [#allocation5]   ;;  %261 = sbr.rel (%p1486_p10) target bundleno = 552 (0x228), region = 44 }
  0x15   : > { %1157 = dma.hbm_to_vmem [thread:$0]  (!%p1155_p13), %s214_s15, 2048, %s216_s17, [#allocation3], %s1386_s27, %s1386_s27, %s1387_s28  }
  0x16   : > { %s232_s8 = sshll.u32 %s1388_s30, 4  ;;  %s233_s8 = int_to_ptr.vmem [resolvable:$true] %s232_s8 }
  0x17   : > { %1160 = dma.hbm_to_vmem [thread:$0]  (!%p1155_p13), %s231_s20, 1024, %s233_s8, [#allocation6], %s1386_s27, %s1386_s27, %s1387_s28  }
  0x19   : > { %1350 = dma.done.wait (%p1490_p11), [#allocation3], 2048  }
  0x1a   : > { %1352 = vsyncadd (%p1490_p11), [#allocation3], 4294965248 }
  0x1b   : > { %1354 = dma.done.wait (%p1490_p11), [#allocation6], 1024  }
  0x1c   : > { %1356 = vsyncadd (%p1490_p11), [#allocation6], 4294966272  ;;  %p299_p0 = scmp.lt.s32.totalorder %s1375_s24, 1  ;;  %v1389_v0 = vmov 0   ;;  %v1127_v2 = vld [vmem:[#allocation2 + $0x38] sm:$0xff]  ;;  %v1126_v4 = vld [vmem:[#allocation2 + $0x30] sm:$0xff] }
  0x1d   : > { %1229 = vset.pattern.permute.xlu0 %v1389_v0  ;;  %v1135_v3 = vld [vmem:[#allocation2 + $0x78] sm:$0xff]  ;;  %760 = vmatpush.bf16.msra.mxu0 %v1127_v2  ;;  %v1134_v5 = vld [vmem:[#allocation2 + $0x70] sm:$0xff]  ;;  %v1230_v6 = vld [vmem:[%s1627_s1] ss:$0 sm:$0xff]  ;;  %v1390_v30 = vmov 683565275  }
  0x1e   : > { %s300_s11 = scalar_select %p299_p0, %s1375_s24, 1  ;;  %773 = vmatpush.bf16.msra.mxu1 %v1135_v3  ;;  %v1125_v7 = vld [vmem:[#allocation2 + $0x28] sm:$0xff]  ;;  %v1124_v11 = vld [vmem:[#allocation2 + $0x20] sm:$0xff]  ;;  %v1123_v15 = vld [vmem:[#allocation2 + $0x18] sm:$0xff]  ;;  %v1391_v32 = vmov 2475754826  }
  0x1f   : > { %v1133_v8 = vld [vmem:[#allocation2 + $0x68] sm:$0xff]  ;;  %v1132_v12 = vld [vmem:[#allocation2 + $0x60] sm:$0xff]  ;;  %v1131_v16 = vld [vmem:[#allocation2 + $0x58] sm:$0xff]  ;;  %v1392_v34 = vmov 2131351028   ;;  %s296_s20 = sand.u32 1, %s1367_s22  }
  0x20   : > { %s1012_s13 = sshll.u32 %s300_s11, 3  ;;  %v1122_v20 = vld [vmem:[#allocation2 + $0x10] sm:$0xff]  ;;  %v1121_v25 = vld [vmem:[#allocation2 + $0x8] sm:$0xff]  ;;  %v1393_v36 = vmov 2102212464   ;;  %v1120_v43 = vld [vmem:[#allocation2] sm:$0xff] }
  0x21   : > { %s305_s16 = scalar_lea.vmem %s1626_s0, %s1012_s13  ;;  %761 = vmatpush.bf16.msra.mxu0 %v1126_v4  ;;  %v1130_v21 = vld [vmem:[#allocation2 + $0x50] sm:$0xff]  ;;  %v1129_v27 = vld [vmem:[#allocation2 + $0x48] sm:$0xff]  ;;  %v1394_v41 = vmov 920167782   ;;  %v1395_v45 = vmov 1326507024  }
  0x22   : > { %v307_v1 = vld [vmem:[%s305_s16] sm:$0xff]  ;;  %774 = vmatpush.bf16.msra.mxu1 %v1134_v5  ;;  %s1011_s27 = sshll.u32 %s296_s20, 2  ;;  %s1117_s28 = sshll.u32 %s1375_s24, 2 }
  0x23   : > { %310 = vperm.xlu0 %1229, %v307_v1   ;;  %v1128_v48 = vld [vmem:[#allocation2 + $0x40] sm:$0xff]  ;;  %s903_s14 = scalar_lea.hbm %s1632_s6, %s1117_s28  ;;  %s298_s15 = scalar_lea.vmem [#allocation7], %s1011_s27 }
  0x24   : > { %s905_s16 = sshll.u32 %s298_s15, 4  ;;  %s907_s12 = sshll.u32 %s903_s14, 4  ;;  %s906_s16 = int_to_ptr.vmem [resolvable:$true] %s905_s16  ;;  %s908_s12 = int_to_ptr.hbm [resolvable:$true] %s907_s12 }
  0x25   : > { %762 = vmatpush.bf16.msra.mxu0 %v1125_v7  ;;  %s891_s17 = scalar_lea.sflag [#allocation4], %s296_s20  ;;  %s1311_s24 = sshra.s32 %s908_s12, 4  ;;  %s1312_s24 = int_to_ptr.hbm [resolvable:$true] %s1311_s24 }
  0x26   : > { %775 = vmatpush.bf16.msra.mxu1 %v1133_v8  ;;  %s1313_s18 = scalar_lea.hbm %s1312_s24, 4  ;;  %s1317_s28 = scalar_lea.hbm %s1632_s6, 8 }
  0x27   : > { %p1314_p1 = scmp.ne.s32.totalorder %s1312_s24, %s1313_s18  ;;  %p1318_p5 = scmp.lt.s32.totalorder %s1312_s24, %s1632_s6 }
  0x28   : > { %p1319_p6 = scmp.lt.s32.totalorder %s1317_s28, %s1313_s18 }
  0x29   : > { %763 = vmatpush.bf16.msra.mxu0 %v1124_v11  ;;  %p1315_p2 = pnand %p1314_p1, %p1471_p4 }
  0x2a   : > { %776 = vmatpush.bf16.msra.mxu1 %v1132_v12  ;;  %p1320_p7 = por %p1319_p6, %p1318_p5 }
  0x2b   : > { %p1316_p3 = pneg %p1315_p2 }
  0x2d   : > { %764 = vmatpush.bf16.msra.mxu0 %v1123_v15  ;;  %p1321_p9 = pnand %p1320_p7, %p1316_p3 }
  0x2e   : > { %777 = vmatpush.bf16.msra.mxu1 %v1131_v16 }
  0x31   : > { %765 = vmatpush.bf16.msra.mxu0 %v1122_v20 }
  0x32   : > { %778 = vmatpush.bf16.msra.mxu1 %v1130_v21 }
  0x35   : > { %766 = vmatpush.bf16.msra.mxu0 %v1121_v25 }
  0x36   : > { %779 = vmatpush.bf16.msra.mxu1 %v1129_v27 }
  0x39   : > { %767 = vmatpush.bf16.msra.mxu0 %v1120_v43 }
  0x3a   : > { %780 = vmatpush.bf16.msra.mxu1 %v1128_v48 }
  0x95   : > { %v311_v9 = vpop.permute.xlu0 %310 }
  0x96   : > { %v1523_v10 = vmul.f32 %v1230_v6, %v311_v9 }
  0x98   : > { %v320_v13 = vand.u32 2139095040, %v1523_v10  ;;  %v317_v17 = vand.u32 2147483647, %v1523_v10  ;;  %vm319_vm12 = vcmp.lt.s32.totalorder %v1523_v10, 0 }
  0x9a   : > { %v321_v14 = vshrl.u32 %v320_v13, 23  ;;  %v324_v22 = vand.u32 8388607, %v317_v17  ;;  %vm318_vm13 = vcmp.le.f32.partialorder %v317_v17, 0.7853982 }
  0x9c   : > { %v1013_v18 = vadd.s32 4294967169, %v321_v14  ;;  %v325_v26 = vor.u32 8388608, %v324_v22 }
  0x9e   : > { %v327_v19 = vadd.s32 1, %v1013_v18  ;;  %v1539_v47 = vshll.u32 %v325_v26, 8 }
  0xa0   : > { %vm328_vm0 = vcmp.gt.s32.totalorder %v327_v19, 0  ;;  %v366_v60 = vand.u32 65535, %v1539_v47  ;;  %v367_v62 = vshrl.u32 %v1539_v47, 16 }
  0xa1   : > { %v329_v23 = vsel %vm328_vm0, %v327_v19, 0 }
  0xa2   : > { %v331_v24 = vand.u32 31, %v329_v23  ;;  %v1529_v28 = vshrl.u32 %v329_v23, 5 }
  0xa4   : > { %v1531_v29 = vsub.s32 32, %v331_v24  ;;  %v334_v31 = vshll.u32 %v1390_v30, %v331_v24  ;;  %v337_v33 = vshll.u32 %v1391_v32, %v331_v24  ;;  %v340_v35 = vshll.u32 %v1392_v34, %v331_v24 }
  0xa5   : > { %v343_v37 = vshll.u32 %v1393_v36, %v331_v24  ;;  %v346_v44 = vshll.u32 %v1394_v41, %v331_v24  ;;  %vm349_vm1 = vcmp.lt.s32.totalorder %v1529_v28, 1  ;;  %vm352_vm2 = vcmp.lt.s32.totalorder %v1529_v28, 4 }
  0xa6   : > { %v335_v38 = vshrl.u32 %v1391_v32, %v1531_v29  ;;  %v338_v39 = vshrl.u32 %v1392_v34, %v1531_v29  ;;  %v341_v40 = vshrl.u32 %v1393_v36, %v1531_v29  ;;  %v344_v42 = vshrl.u32 %v1394_v41, %v1531_v29 }
  0xa7   : > { %v347_v46 = vshrl.u32 %v1395_v45, %v1531_v29  ;;  %vm351_vm3 = vcmp.lt.s32.totalorder %v1529_v28, 3  ;;  %vm350_vm4 = vcmp.lt.s32.totalorder %v1529_v28, 2  ;;  %v333_v25 = vshrl.u32 %v1390_v30, %v1531_v29 }
  0xa8   : > { %v336_v49 = vor.u32 %v335_v38, %v334_v31  ;;  %v339_v50 = vor.u32 %v338_v39, %v337_v33  ;;  %v342_v51 = vor.u32 %v341_v40, %v340_v35  ;;  %v345_v52 = vor.u32 %v344_v42, %v343_v37 }
  0xa9   : > { %v348_v53 = vor.u32 %v347_v46, %v346_v44 }
  0xaa   : > { %v357_v54 = vsel %vm349_vm1, %v336_v49, %v339_v50  ;;  %v358_v55 = vsel %vm352_vm2, %v345_v52, 920167782  ;;  %v361_v56 = vsel %vm349_vm1, %v339_v50, %v342_v51  ;;  %v354_v22 = vsel %vm352_vm2, %v342_v51, 2102212464 }
  0xab   : > { %v359_v57 = vsel %vm351_vm3, %v342_v51, %v358_v55  ;;  %v362_v58 = vsel %vm352_vm2, %v348_v53, 1326507024  ;;  %v353_v34 = vsel %vm349_vm1, %v333_v25, %v336_v49  ;;  %v355_v35 = vsel %vm351_vm3, %v339_v50, %v354_v22 }
  0xac   : > { %v363_v59 = vsel %vm351_vm3, %v345_v52, %v362_v58  ;;  %v360_v61 = vsel %vm350_vm4, %v357_v54, %v359_v57  ;;  %v356_v30 = vsel %vm350_vm4, %v353_v34, %v355_v35 }
  0xad   : > { %v364_v63 = vsel %vm350_vm4, %v361_v56, %v363_v59  ;;  %v390_v1 = vand.u32 65535, %v360_v61  ;;  %v391_v2 = vshrl.u32 %v360_v61, 16  ;;  %v410_v44 = vmul.u32 %v1539_v47, %v356_v30 }
  0xae   : > { %v368_v3 = vand.u32 65535, %v364_v63  ;;  %v369_v4 = vshrl.u32 %v364_v63, 16  ;;  %vm460_vm4 = vweird.f32 %v1523_v10 }
  0xaf   : > { %v393_v5 = vmul.u32 %v391_v2, %v366_v60  ;;  %v394_v6 = vmul.u32 %v390_v1, %v367_v62  ;;  %v392_v9 = vmul.u32 %v390_v1, %v366_v60  ;;  %v395_v14 = vmul.u32 %v391_v2, %v367_v62 }
  0xb0   : > { %v371_v7 = vmul.u32 %v369_v4, %v366_v60  ;;  %v372_v8 = vmul.u32 %v368_v3, %v367_v62  ;;  %v370_v12 = vmul.u32 %v368_v3, %v366_v60  ;;  %v373_v15 = vmul.u32 %v369_v4, %v367_v62 }
  0xb1   : > { %v396_v11 = vshll.u32 %v393_v5, 16  ;;  %v398_v16 = vshll.u32 %v394_v6, 16  ;;  %v397_v32 = vshrl.u32 %v393_v5, 16  ;;  %v399_v38 = vshrl.u32 %v394_v6, 16 }
  0xb2   : > { %v374_v13 = vshll.u32 %v371_v7, 16  ;;  %v376_v19 = vshll.u32 %v372_v8, 16  ;;  %v375_v36 = vshrl.u32 %v371_v7, 16  ;;  %v377_v40 = vshrl.u32 %v372_v8, 16 }
  0xb3   : > { %vm400_vm5 = vc.u32 %v392_v9, %v396_v11  ;;  %v402_v18 = vadd.s32 %v396_v11, %v392_v9 }
  0xb4   : > { %vm378_vm6 = vc.u32 %v370_v12, %v374_v13  ;;  %v380_v20 = vadd.s32 %v374_v13, %v370_v12  ;;  %v401_v21 = vsel %vm400_vm5, 1, %v1389_v0 }
  0xb5   : > { %v379_v23 = vsel %vm378_vm6, 1, %v1389_v0  ;;  %v403_v24 = vadd.s32 %v401_v21, %v395_v14  ;;  %vm404_vm7 = vc.u32 %v402_v18, %v398_v16 }
  0xb6   : > { %v381_v26 = vadd.s32 %v379_v23, %v373_v15  ;;  %vm382_vm8 = vc.u32 %v380_v20, %v376_v19  ;;  %v405_v27 = vsel %vm404_vm7, 1, %v1389_v0 }
  0xb7   : > { %v383_v31 = vsel %vm382_vm8, 1, %v1389_v0  ;;  %v407_v33 = vadd.s32 %v405_v27, %v403_v24  ;;  %v406_v0 = vadd.s32 %v402_v18, %v398_v16 }
  0xb8   : > { %v385_v37 = vadd.s32 %v383_v31, %v381_v26 }
  0xb9   : > { %v408_v39 = vadd.s32 %v407_v33, %v397_v32 }
  0xba   : > { %v386_v29 = vadd.s32 %v385_v37, %v375_v36 }
  0xbb   : > { %v409_v41 = vadd.s32 %v408_v39, %v399_v38 }
  0xbc   : > { %v387_v42 = vadd.s32 %v386_v29, %v377_v40 }
  0xbd   : > { %v413_v43 = vadd.s32 1, %v409_v41 }
  0xbe   : > { %vm412_vm9 = vc.u32 %v387_v42, %v406_v0  ;;  %v411_v56 = vadd.s32 %v406_v0, %v387_v42  ;;  %v1142_v42 = vld [vmem:[#allocation5 + $0x30] sm:$0xff]  ;;  %v1141_v0 = vld [vmem:[#allocation5 + $0x28] sm:$0xff] }
  0xbf   : > { %v414_v45 = vsel %vm412_vm9, %v413_v43, %v409_v41  ;;  %v1143_v41 = vld [vmem:[#allocation5 + $0x38] sm:$0xff]  ;;  %v1140_v43 = vld [vmem:[#allocation5 + $0x20] sm:$0xff] }
  0xc0   : > { %v415_v46 = vadd.s32 %v414_v45, %v410_v44  ;;  %875 = vmatpush.bf16.msra.mxu2 %v1143_v41  ;;  %v1139_v44 = vld [vmem:[#allocation5 + $0x18] sm:$0xff]  ;;  %v1138_v45 = vld [vmem:[#allocation5 + $0x10] sm:$0xff] }
  0xc2   : > { %v416_v48 = vadd.s32 536870912, %v415_v46 }
  0xc4   : > { %v417_v49 = vshrl.u32 %v416_v48, 30  ;;  %876 = vmatpush.bf16.msra.mxu2 %v1142_v42 }
  0xc6   : > { %v418_v50 = vshll.u32 %v417_v49, 30  ;;  %v441_v6 = vsub.s32 4, %v417_v49 }
  0xc8   : > { %v419_v51 = vsub.s32 %v415_v46, %v418_v50  ;;  %v442_v12 = vsel %vm319_vm12, %v441_v6, %v417_v49  ;;  %877 = vmatpush.bf16.msra.mxu2 %v1141_v0  ;;  %v1137_v46 = vld [vmem:[#allocation5 + $0x8] sm:$0xff] }
  0xc9   : > { %v444_v15 = vsel %vm318_vm13, 0, %v442_v12 }
  0xca   : > { %vm420_vm10 = vcmp.lt.s32.totalorder %v419_v51, 0  ;;  %v421_v52 = vsub.s32 0, %v419_v51  ;;  %v615_v21 = vadd.s32 3, %v444_v15  ;;  %v461_v25 = vand.u32 3, %v444_v15 }
  0xcc   : > { %v422_v53 = vsel %vm420_vm10, %v421_v52, %v419_v51  ;;  %v616_v26 = vand.u32 3, %v615_v21  ;;  %vm462_vm14 = vcmp.lt.s32.totalorder %v461_v25, 2  ;;  %vm463_vm15 = vcmp.eq.s32.totalorder %v461_v25, 0  ;;  %878 = vmatpush.bf16.msra.mxu2 %v1140_v43 }
  0xcd   : > { %v423_v54 = vclz %v422_v53  ;;  %vm466_vm0 = vcmp.eq.s32.totalorder %v461_v25, 2 }
  0xce   : > { %vm617_vm1 = vcmp.lt.s32.totalorder %v616_v26, 2  ;;  %vm618_vm2 = vcmp.eq.s32.totalorder %v616_v26, 0  ;;  %vm621_vm3 = vcmp.eq.s32.totalorder %v616_v26, 2 }
  0xcf   : > { %v1014_v55 = vadd.s32 4294967294, %v423_v54 }
  0xd0   : > { %879 = vmatpush.bf16.msra.mxu2 %v1139_v44 }
  0xd1   : > { %vm1015_vm11 = vcmp.lt.s32.totalorder %v1014_v55, 0 }
  0xd2   : > { %v426_v28 = vsel %vm1015_vm11, 0, %v1014_v55 }
  0xd3   : > { %v427_v57 = vsub.s32 32, %v426_v28  ;;  %v431_v58 = vsub.s32 4294967266, %v426_v28  ;;  %v428_v59 = vshll.u32 %v419_v51, %v426_v28  ;;  %v1136_v51 = vld [vmem:[#allocation5] sm:$0xff] }
  0xd4   : > { %880 = vmatpush.bf16.msra.mxu2 %v1138_v45 }
  0xd5   : > { %v429_v60 = vshrl.u32 %v411_v56, %v427_v57  ;;  %v432_v47 = vadd.s32 127, %v431_v58 }
  0xd7   : > { %v430_v61 = vor.u32 %v429_v60, %v428_v59  ;;  %v433_v62 = vshll.u32 %v432_v47, 23 }
  0xd8   : > { %881 = vmatpush.bf16.msra.mxu2 %v1137_v46 }
  0xd9   : > { %v434_v63 = vor.u32 4788187, %v433_v62  ;;  %v437_v2 = vcvt.s32.f32 %v430_v61 }
  0xdb   : > { %v435_v1 = vand.u32 2147483647, %v434_v63 }
  0xdc   : > { %882 = vmatpush.bf16.msra.mxu2 %v1136_v51 }
  0xdd   : > { %v438_v3 = vmul.f32 %v437_v2, %v435_v1 }
  0xdf   : > { %v439_v4 = vxor.u32 2147483648, %v438_v3 }
  0xe1   : > { %v440_v5 = vsel %vm319_vm12, %v439_v4, %v438_v3 }
  0xe2   : > { %v443_v7 = vsel %vm318_vm13, %v1523_v10, %v440_v5  ;;  %v1231_v10 = vld [vmem:[%s1629_s3] ss:$0 sm:$0xff] }
  0xe3   : > { %v445_v8 = vmul.f32 %v443_v7, %v443_v7  ;;  %v1232_v5 = vld [vmem:[%s1631_s5] ss:$0 sm:$0xff] }
  0xe5   : > { %v446_v9 = vmul.f32 -0.001358992, %v445_v8  ;;  %v453_v11 = vmul.f32 -0.00019511016, %v445_v8 }
  0xe7   : > { %v447_v13 = vadd.f32 0.041655596, %v446_v9  ;;  %v454_v14 = vadd.f32 0.008332121, %v453_v11 }
  0xe9   : > { %v448_v16 = vmul.f32 %v447_v13, %v445_v8  ;;  %v455_v18 = vmul.f32 %v454_v14, %v445_v8 }
  0xeb   : > { %v449_v19 = vadd.f32 -0.4999988, %v448_v16  ;;  %v456_v20 = vadd.f32 -0.16666654, %v455_v18 }
  0xed   : > { %v450_v22 = vmul.f32 %v449_v19, %v445_v8  ;;  %v457_v23 = vmul.f32 %v456_v20, %v445_v8 }
  0xef   : > { %v451_v24 = vadd.f32 1.0, %v450_v22  ;;  %v458_v17 = vadd.f32 1.0, %v457_v23 }
  0xf1   : > { %v459_v27 = vmul.f32 %v458_v17, %v443_v7  ;;  %v467_v31 = vxor.u32 2147483648, %v451_v24 }
  0xf3   : > { %v464_v32 = vxor.u32 2147483648, %v459_v27  ;;  %v468_v34 = vsel %vm466_vm0, %v467_v31, %v459_v27  ;;  %v623_v36 = vsel %vm621_vm3, %v467_v31, %v459_v27 }
  0xf5   : > { %v465_v33 = vsel %vm463_vm15, %v451_v24, %v464_v32  ;;  %v620_v35 = vsel %vm618_vm2, %v451_v24, %v464_v32 }
  0xf6   : > { %v469_v37 = vsel %vm462_vm14, %v465_v33, %v468_v34  ;;  %v624_v38 = vsel %vm617_vm1, %v620_v35, %v623_v36 }
  0xf7   : > { %v470_v39 = vsel %vm460_vm4, nan, %v469_v37  ;;  %v625_v40 = vsel %vm460_vm4, nan, %v624_v38 }
  0xf8   : > { %v626_v29 = vpack.c.bf16 %v470_v39, %v470_v39  ;;  %v627_v30 = vpack.c.bf16 %v625_v40, %v625_v40 }
  0xfa   : > { %768 = vmatmul.bf16.vlgmr.msra.gmra.mxu0 %v626_v29  ;;  %781 = vmatmul.bf16.vlgmr.msra.gmra.mxu1 %v627_v30 }
 0x177   : > { %v769_v48 = vpop.f32.mrf.mxu0  ;;  %v782_v49 = vpop.f32.mrf.mxu1 }
 0x178   : > { %v770_v50 = vadd.f32 %v1231_v10, %v769_v48 }
 0x17a   : > { %v783_v52 = vadd.f32 %v782_v49, %v770_v50 }
 0x17c   : > { %v1083_v53 = vmul.f32 -1.442695, %v783_v52 }
 0x17e   : > { %1233 = vpow2.f32 %v1083_v53 }
 0x17f   : > { %v771_v54 = vpop.f32.mrf.mxu0  ;;  %v784_v55 = vpop.f32.mrf.mxu1 }
 0x184   : > { %v1234_v28 = vpop.eup %1233 }
 0x185   : > { %v789_v56 = vadd.f32 1.0, %v1234_v28 }
 0x187   : > { %1235 = vrcp.f32 %v789_v56  ;;  %v801_v60 = vand.u32 2147483648, %v789_v56  ;;  %v799_v61 = vand.u32 2147483647, %v789_v56  ;;  %vm795_vm6 = vweird.f32 %v789_v56 }
 0x189   : > { %v802_v63 = vor.u32 1.1754944e-38, %v801_v60  ;;  %vm800_vm8 = vcmp.eq.f32.partialorder %v799_v61, 8.507059e+37 }
 0x18d   : > { %v1236_v57 = vpop.eup %1235 }
 0x18e   : > { %v791_v58 = vmul.f32 %v1236_v57, %v789_v56  ;;  %vm796_vm5 = vweird.f32 %v1236_v57 }
 0x18f   : > { %vm797_vm7 = vmor %vm795_vm6, %vm796_vm5 }
 0x190   : > { %v792_v59 = vsub.f32 1.0, %v791_v58 }
 0x192   : > { %v793_v47 = vmul.f32 %v1236_v57, %v792_v59 }
 0x194   : > { %v794_v62 = vadd.f32 %v1236_v57, %v793_v47 }
 0x196   : > { %v798_v1 = vsel %vm797_vm7, %v1236_v57, %v794_v62 }
 0x197   : > { %v803_v2 = vsel %vm800_vm8, %v802_v63, %v798_v1 }
 0x198   : > { %v805_v3 = vmul.f32 %v803_v2, %v783_v52 }
 0x19a   : > { %v806_v4 = vpack.c.bf16 %v805_v3, %v805_v3 }
 0x19c   : > { %883 = vmatmul.bf16.vlgmr.msra.gmra.mxu2 %v806_v4 }
 0x21f   : > { %v884_v6 = vpop.f32.mrf.mxu2 }
 0x220   : > { %v885_v7 = vadd.f32 %v1232_v5, %v884_v6 }
 0x222   : > { %v888_v8 = vpack.c.bf16 %v885_v7, %v885_v7 }
 0x224   : > { %889 = vst [vmem:[%s298_s15] sm:$0xf] %v888_v8 }
 0x225   : > { %1324 = shalt.err (!%p1321_p9)
}
 0x226   : > { %1152 = dma.vmem_to_hbm [thread:$0]  (%p1471_p4), %s906_s16, 64, %s908_s12, %s891_s17  }
 0x227   : > { %v886_v9 = vpop.f32.mrf.mxu2 }
 0x228 PF: > { %p1169_p10 = scmp.ge.s32.totalorder %s1383_s26, 2  ;;  %s919_s20 = sand.u32 1, %s1363_s21  }
 0x229   : > { %s920_s11 = scalar_lea.sflag [#allocation4], %s919_s20 }
 0x22a   : > { %p1162_p11 = pnand %p1169_p10, %p1478_p8 }
 0x22c   : > { %p1163_p12 = pneg %p1162_p11 }
 0x22e   : > { %1358 = dma.done.wait (%p1163_p12), %s920_s11, 64  }
 0x22f   : > { %1360 = vsyncadd (%p1163_p12), %s920_s11, 4294967232  ;;  %s21_s26 = sadd.s32 1, %s1383_s26   ;;  %s1637_s21 = smov %s1367_s22 }
 0x230   : > { %p18_p13 = scmp.ge.s32.totalorder %s21_s26, 4   ;;  %s1638_s22 = smov %s1371_s23 }
 0x231   : > { %s1639_s23 = smov %s1484_s10  ;;  %s1640_s24 = smov %s1379_s25 }
 0x232   : > { %s1641_s25 = smov %s1643_s29  ;;  %20 = sbr.rel (!%p18_p13) target bundleno = 6 (0x6), region = 88 }
 0x237   :  { %926 = vsyncpa [#allocation3], 1 }
 0x238   :  { %928 = vsyncpa [#allocation3 + $0x1], 1 }
 0x239   :  { %929 = vsyncpa [#allocation6], 1 }
 0x23a   :  { %930 = vsyncpa [#allocation4], 1 }
 0x23b   :  { %932 = vsyncpa [#allocation4 + $0x1], 1 }

</bundles_post_ra>
